<compile_context>
chip_gen: v7x
topology: tpu7x:2x2x1
jax: 0.10.0
libtpu: 0.0.40
codegen_flags: <defaults>
</compile_context>

<pallas_src>
import functools

import jax
import jax.numpy as jnp
from jax.experimental import pallas as pl
from jax.experimental.pallas import tpu as pltpu


def conv1d_kernel(x_ref, w_ref, b_ref, o_ref, xpad_ref, *, ks, C, L, pad, n_acc=4):
    """One block of batch rows per grid step.

    x_ref    : (Nb, C, L)   input tile in VMEM (native layout, batch on leading axis)
    w_ref    : (C*ks,)      flat conv weights in SMEM (scalar reads)
    b_ref    : (1,)         conv bias in SMEM
    o_ref    : (Nb, L)      output tile in VMEM
    xpad_ref : (Nb, C, Lp)  VMEM scratch holding the zero-padded block (in-kernel halo)
    """
    Nb = o_ref.shape[0]
    Lp = L + 2 * pad
    f32 = jnp.float32

    # In-kernel zero padding: write the halos and the interior of the scratch.  This
    # replaces the host-side jnp.pad + transpose (no extra HBM pass over x).
    zero_halo = jnp.zeros((Nb, C, pad), f32)
    xpad_ref[:, :, 0:pad] = zero_halo
    xpad_ref[:, :, pad + L:Lp] = zero_halo
    xpad_ref[:, :, pad:pad + L] = x_ref[...].astype(f32)   # cast hoisted (once, not per tap)

    # Independent partial accumulators -> multiple FMA chains the VLIW packer can co-issue.
    partials = [None] * n_acc
    for c in range(C):
        # Single load of the padded channel plane; tap-shifted views below are static
        # in-register lane slices of this value, not re-loads from VMEM.
        xc = xpad_ref[:, c, :]                             # (Nb, Lp) float32
        for k in range(ks):
            term = xc[:, k:k + L] * w_ref[c * ks + k]      # scalar tap weight (SMEM) * plane
            a = k % n_acc
            partials[a] = term if partials[a] is None else partials[a] + term

    # Balanced tree-sum of the partial accumulators, fold in the bias once.
    parts = [p for p in partials if p is not None]
    while len(parts) > 1:
        nxt = [parts[i] + parts[i + 1] for i in range(0, len(parts) - 1, 2)]
        if len(parts) % 2:
            nxt.append(parts[-1])
        parts = nxt
    o_ref[...] = (parts[0] + b_ref[0]).astype(o_ref.dtype)


def _pick_batch_block(N, L):
    """Batch rows per grid step.

    Multiple of 8 (sublane group); sized so a handful of live (Nb, L) f32 values (partial
    accumulators + channel plane) stay within the 64x4KiB vreg file while still being large
    enough to amortize the per-step pipeline overhead.  Small N takes the whole batch.
    """
    if N <= 8:
        return N
    max_rows = max(8, (4096 // max(L, 1)) & ~7)   # keep Nb * L <= ~4K elements per value
    nb = min(N, 1024, max_rows)
    return max(8, (nb // 8) * 8)


def conv_forward(x, weight, bias, *, ks):
    """x: (N, C, L) float32; weight: (1, C, ks); bias: (1,).  Returns (N, L)."""
    N, C, L = x.shape
    pad = (ks - 1) // 2
    Lp = L + 2 * pad

    w1d = weight.reshape(C * ks).astype(jnp.float32)   # 1-D SMEM (pads to pow2, not 8x128)
    b1d = bias.reshape(1).astype(jnp.float32)

    Nb = _pick_batch_block(N, L)
    grid = (pl.cdiv(N, Nb),)

    # Double-buffered in/out blocks + scratch, with headroom; capped v7x-safe (<= 32 MiB).
    block_bytes = 4 * (2 * Nb * C * L + 2 * Nb * L + Nb * C * Lp)
    vmem_limit = int(min(32 * 1024 * 1024, max(4 * 1024 * 1024, 4 * block_bytes)))

    out = pl.pallas_call(
        functools.partial(conv1d_kernel, ks=ks, C=C, L=L, pad=pad),
        out_shape=jax.ShapeDtypeStruct((N, L), x.dtype),
        grid=grid,
        in_specs=[
            pl.BlockSpec((Nb, C, L), lambda i: (i, 0, 0)),
            pl.BlockSpec(memory_space=pltpu.MemorySpace.SMEM),
            pl.BlockSpec(memory_space=pltpu.MemorySpace.SMEM),
        ],
        out_specs=pl.BlockSpec((Nb, L), lambda i: (i, 0)),
        scratch_shapes=[pltpu.VMEM((Nb, C, Lp), jnp.float32)],
        compiler_params=pltpu.CompilerParams(
            dimension_semantics=("parallel",),
            vmem_limit_bytes=vmem_limit,
        ),
    )(x, w1d, b1d)

    return out                       # already (N, L) == conv(x).squeeze(1)


def conv_reference(x, weight, bias, *, ks):
    """Pure-JAX reference (lax conv) for correctness checking."""
    pad = (ks - 1) // 2
    y = jax.lax.conv_general_dilated(
        x, weight, window_strides=(1,), padding=[(pad, pad)],
        dimension_numbers=("NCH", "OIH", "NCH"))
    return (y + bias.reshape(1, 1, 1))[:, 0, :]


if __name__ == "__main__":
    # Module config: channel=4, ks=9.  Input implied by the forward: (batch, channel, seq).
    channel, ks = 4, 9

    key = jax.random.PRNGKey(0)
    kx, kw, kb, kx2 = jax.random.split(key, 4)

    # Deterministic synthetic parameters (PyTorch-style uniform init bounds).
    bound = 1.0 / (channel * ks) ** 0.5
    weight = jax.random.uniform(kw, (1, channel, ks), jnp.float32, -bound, bound)
    bias = jax.random.uniform(kb, (1,), jnp.float32, -bound, bound)

    # Small shape consistent with the module: batch=2, channel=4, seq=16.
    x = jax.random.normal(kx, (2, channel, 16), jnp.float32)
    out = jax.block_until_ready(conv_forward(x, weight, bias, ks=ks))
    ref = conv_reference(x, weight, bias, ks=ks)
    assert out.shape == (2, 16)
    assert jnp.allclose(out, ref, atol=1e-5, rtol=1e-5)

    # Multi-block grid + non-divisible tail block (N % Nb != 0), per the review's concern.
    x2 = jax.random.normal(kx2, (20, channel, 16), jnp.float32)
    out2 = jax.block_until_ready(conv_forward(x2, weight, bias, ks=ks))
    ref2 = conv_reference(x2, weight, bias, ks=ks)
    assert out2.shape == (20, 16)
    assert jnp.allclose(out2, ref2, atol=1e-5, rtol=1e-5)

    print("KERNEL_OK")
</pallas_src>

<mosaic_0001>
module attributes {stable_mosaic.version = 11 : i64} {
  func.func @conv1d_kernel(%arg0: i32, %arg1: memref<2x4x16xf32, #tpu.memory_space<vmem>>, %arg2: memref<36xf32, #tpu.memory_space<smem>>, %arg3: memref<1xf32, #tpu.memory_space<smem>>, %arg4: memref<2x16xf32, #tpu.memory_space<vmem>>, %arg5: memref<2x4x24xf32, #tpu.memory_space<vmem>>) attributes {dimension_semantics = [#tpu.dimension_semantics<parallel>], iteration_bounds = array<i64: 1>, scalar_prefetch = 0 : i64, scratch_operands = 1 : i64, tpu.core_type = #tpu.core_type<tc>, window_params = [{transform_indices = @transform_0, window_bounds = array<i64: 2, 4, 16>}, {transform_indices = @transform_1, window_bounds = array<i64: 36>}, {transform_indices = @transform_2, window_bounds = array<i64: 1>}, {transform_indices = @transform_3, window_bounds = array<i64: 2, 16>}]} {
    %cst = arith.constant 0.000000e+00 : f32
    %0 = vector.broadcast %cst : f32 to vector<2x4x4xf32>
    %c0 = arith.constant 0 : index
    %c0_0 = arith.constant 0 : index
    %c0_1 = arith.constant 0 : index
    %1 = vector.load %arg5[%c0, %c0_0, %c0_1] : memref<2x4x24xf32, #tpu.memory_space<vmem>>, vector<2x4x4xf32>
    tpu.vector_store %arg5[%c0, %c0_0, %c0_1], %0 {strides = array<i32>} : memref<2x4x24xf32, #tpu.memory_space<vmem>>, vector<2x4x4xf32>,
    %c0_2 = arith.constant 0 : index
    %c0_3 = arith.constant 0 : index
    %c20 = arith.constant 20 : index
    %2 = vector.load %arg5[%c0_2, %c0_3, %c20] : memref<2x4x24xf32, #tpu.memory_space<vmem>>, vector<2x4x4xf32>
    tpu.vector_store %arg5[%c0_2, %c0_3, %c20], %0 {strides = array<i32>} : memref<2x4x24xf32, #tpu.memory_space<vmem>>, vector<2x4x4xf32>,
    %c0_4 = arith.constant 0 : index
    %c0_5 = arith.constant 0 : index
    %c0_6 = arith.constant 0 : index
    %3 = vector.load %arg1[%c0_4, %c0_5, %c0_6] : memref<2x4x16xf32, #tpu.memory_space<vmem>>, vector<2x4x16xf32>
    %c0_7 = arith.constant 0 : index
    %c0_8 = arith.constant 0 : index
    %c4 = arith.constant 4 : index
    %4 = vector.load %arg5[%c0_7, %c0_8, %c4] : memref<2x4x24xf32, #tpu.memory_space<vmem>>, vector<2x4x16xf32>
    tpu.vector_store %arg5[%c0_7, %c0_8, %c4], %3 {strides = array<i32>} : memref<2x4x24xf32, #tpu.memory_space<vmem>>, vector<2x4x16xf32>,
    %c0_9 = arith.constant 0 : index
    %c0_10 = arith.constant 0 : index
    %c0_11 = arith.constant 0 : index
    %5 = vector.load %arg5[%c0_9, %c0_10, %c0_11] : memref<2x4x24xf32, #tpu.memory_space<vmem>>, vector<2x1x24xf32>
    %6 = vector.shape_cast %5 : vector<2x1x24xf32> to vector<2x24xf32>
    %7 = vector.extract_strided_slice %6 {offsets = [0, 0], sizes = [2, 16], strides = [1, 1]} : vector<2x24xf32> to vector<2x16xf32>
    %c0_12 = arith.constant 0 : index
    %8 = memref.load %arg2[%c0_12] : memref<36xf32, #tpu.memory_space<smem>>
    %9 = vector.broadcast %8 : f32 to vector<2x16xf32>
    %10 = arith.mulf %7, %9 : vector<2x16xf32>
    %11 = vector.extract_strided_slice %6 {offsets = [0, 1], sizes = [2, 16], strides = [1, 1]} : vector<2x24xf32> to vector<2x16xf32>
    %c1 = arith.constant 1 : index
    %12 = memref.load %arg2[%c1] : memref<36xf32, #tpu.memory_space<smem>>
    %13 = vector.broadcast %12 : f32 to vector<2x16xf32>
    %14 = arith.mulf %11, %13 : vector<2x16xf32>
    %15 = vector.extract_strided_slice %6 {offsets = [0, 2], sizes = [2, 16], strides = [1, 1]} : vector<2x24xf32> to vector<2x16xf32>
    %c2 = arith.constant 2 : index
    %16 = memref.load %arg2[%c2] : memref<36xf32, #tpu.memory_space<smem>>
    %17 = vector.broadcast %16 : f32 to vector<2x16xf32>
    %18 = arith.mulf %15, %17 : vector<2x16xf32>
    %19 = vector.extract_strided_slice %6 {offsets = [0, 3], sizes = [2, 16], strides = [1, 1]} : vector<2x24xf32> to vector<2x16xf32>
    %c3 = arith.constant 3 : index
    %20 = memref.load %arg2[%c3] : memref<36xf32, #tpu.memory_space<smem>>
    %21 = vector.broadcast %20 : f32 to vector<2x16xf32>
    %22 = arith.mulf %19, %21 : vector<2x16xf32>
    %23 = vector.extract_strided_slice %6 {offsets = [0, 4], sizes = [2, 16], strides = [1, 1]} : vector<2x24xf32> to vector<2x16xf32>
    %c4_13 = arith.constant 4 : index
    %24 = memref.load %arg2[%c4_13] : memref<36xf32, #tpu.memory_space<smem>>
    %25 = vector.broadcast %24 : f32 to vector<2x16xf32>
    %26 = arith.mulf %23, %25 : vector<2x16xf32>
    %27 = arith.addf %10, %26 : vector<2x16xf32>
    %28 = vector.extract_strided_slice %6 {offsets = [0, 5], sizes = [2, 16], strides = [1, 1]} : vector<2x24xf32> to vector<2x16xf32>
    %c5 = arith.constant 5 : index
    %29 = memref.load %arg2[%c5] : memref<36xf32, #tpu.memory_space<smem>>
    %30 = vector.broadcast %29 : f32 to vector<2x16xf32>
    %31 = arith.mulf %28, %30 : vector<2x16xf32>
    %32 = arith.addf %14, %31 : vector<2x16xf32>
    %33 = vector.extract_strided_slice %6 {offsets = [0, 6], sizes = [2, 16], strides = [1, 1]} : vector<2x24xf32> to vector<2x16xf32>
    %c6 = arith.constant 6 : index
    %34 = memref.load %arg2[%c6] : memref<36xf32, #tpu.memory_space<smem>>
    %35 = vector.broadcast %34 : f32 to vector<2x16xf32>
    %36 = arith.mulf %33, %35 : vector<2x16xf32>
    %37 = arith.addf %18, %36 : vector<2x16xf32>
    %38 = vector.extract_strided_slice %6 {offsets = [0, 7], sizes = [2, 16], strides = [1, 1]} : vector<2x24xf32> to vector<2x16xf32>
    %c7 = arith.constant 7 : index
    %39 = memref.load %arg2[%c7] : memref<36xf32, #tpu.memory_space<smem>>
    %40 = vector.broadcast %39 : f32 to vector<2x16xf32>
    %41 = arith.mulf %38, %40 : vector<2x16xf32>
    %42 = arith.addf %22, %41 : vector<2x16xf32>
    %43 = vector.extract_strided_slice %6 {offsets = [0, 8], sizes = [2, 16], strides = [1, 1]} : vector<2x24xf32> to vector<2x16xf32>
    %c8 = arith.constant 8 : index
    %44 = memref.load %arg2[%c8] : memref<36xf32, #tpu.memory_space<smem>>
    %45 = vector.broadcast %44 : f32 to vector<2x16xf32>
    %46 = arith.mulf %43, %45 : vector<2x16xf32>
    %47 = arith.addf %27, %46 : vector<2x16xf32>
    %c0_14 = arith.constant 0 : index
    %c1_15 = arith.constant 1 : index
    %c0_16 = arith.constant 0 : index
    %48 = vector.load %arg5[%c0_14, %c1_15, %c0_16] : memref<2x4x24xf32, #tpu.memory_space<vmem>>, vector<2x1x24xf32>
    %49 = vector.shape_cast %48 : vector<2x1x24xf32> to vector<2x24xf32>
    %50 = vector.extract_strided_slice %49 {offsets = [0, 0], sizes = [2, 16], strides = [1, 1]} : vector<2x24xf32> to vector<2x16xf32>
    %c9 = arith.constant 9 : index
    %51 = memref.load %arg2[%c9] : memref<36xf32, #tpu.memory_space<smem>>
    %52 = vector.broadcast %51 : f32 to vector<2x16xf32>
    %53 = arith.mulf %50, %52 : vector<2x16xf32>
    %54 = arith.addf %47, %53 : vector<2x16xf32>
    %55 = vector.extract_strided_slice %49 {offsets = [0, 1], sizes = [2, 16], strides = [1, 1]} : vector<2x24xf32> to vector<2x16xf32>
    %c10 = arith.constant 10 : index
    %56 = memref.load %arg2[%c10] : memref<36xf32, #tpu.memory_space<smem>>
    %57 = vector.broadcast %56 : f32 to vector<2x16xf32>
    %58 = arith.mulf %55, %57 : vector<2x16xf32>
    %59 = arith.addf %32, %58 : vector<2x16xf32>
    %60 = vector.extract_strided_slice %49 {offsets = [0, 2], sizes = [2, 16], strides = [1, 1]} : vector<2x24xf32> to vector<2x16xf32>
    %c11 = arith.constant 11 : index
    %61 = memref.load %arg2[%c11] : memref<36xf32, #tpu.memory_space<smem>>
    %62 = vector.broadcast %61 : f32 to vector<2x16xf32>
    %63 = arith.mulf %60, %62 : vector<2x16xf32>
    %64 = arith.addf %37, %63 : vector<2x16xf32>
    %65 = vector.extract_strided_slice %49 {offsets = [0, 3], sizes = [2, 16], strides = [1, 1]} : vector<2x24xf32> to vector<2x16xf32>
    %c12 = arith.constant 12 : index
    %66 = memref.load %arg2[%c12] : memref<36xf32, #tpu.memory_space<smem>>
    %67 = vector.broadcast %66 : f32 to vector<2x16xf32>
    %68 = arith.mulf %65, %67 : vector<2x16xf32>
    %69 = arith.addf %42, %68 : vector<2x16xf32>
    %70 = vector.extract_strided_slice %49 {offsets = [0, 4], sizes = [2, 16], strides = [1, 1]} : vector<2x24xf32> to vector<2x16xf32>
    %c13 = arith.constant 13 : index
    %71 = memref.load %arg2[%c13] : memref<36xf32, #tpu.memory_space<smem>>
    %72 = vector.broadcast %71 : f32 to vector<2x16xf32>
    %73 = arith.mulf %70, %72 : vector<2x16xf32>
    %74 = arith.addf %54, %73 : vector<2x16xf32>
    %75 = vector.extract_strided_slice %49 {offsets = [0, 5], sizes = [2, 16], strides = [1, 1]} : vector<2x24xf32> to vector<2x16xf32>
    %c14 = arith.constant 14 : index
    %76 = memref.load %arg2[%c14] : memref<36xf32, #tpu.memory_space<smem>>
    %77 = vector.broadcast %76 : f32 to vector<2x16xf32>
    %78 = arith.mulf %75, %77 : vector<2x16xf32>
    %79 = arith.addf %59, %78 : vector<2x16xf32>
    %80 = vector.extract_strided_slice %49 {offsets = [0, 6], sizes = [2, 16], strides = [1, 1]} : vector<2x24xf32> to vector<2x16xf32>
    %c15 = arith.constant 15 : index
    %81 = memref.load %arg2[%c15] : memref<36xf32, #tpu.memory_space<smem>>
    %82 = vector.broadcast %81 : f32 to vector<2x16xf32>
    %83 = arith.mulf %80, %82 : vector<2x16xf32>
    %84 = arith.addf %64, %83 : vector<2x16xf32>
    %85 = vector.extract_strided_slice %49 {offsets = [0, 7], sizes = [2, 16], strides = [1, 1]} : vector<2x24xf32> to vector<2x16xf32>
    %c16 = arith.constant 16 : index
    %86 = memref.load %arg2[%c16] : memref<36xf32, #tpu.memory_space<smem>>
    %87 = vector.broadcast %86 : f32 to vector<2x16xf32>
    %88 = arith.mulf %85, %87 : vector<2x16xf32>
    %89 = arith.addf %69, %88 : vector<2x16xf32>
    %90 = vector.extract_strided_slice %49 {offsets = [0, 8], sizes = [2, 16], strides = [1, 1]} : vector<2x24xf32> to vector<2x16xf32>
    %c17 = arith.constant 17 : index
    %91 = memref.load %arg2[%c17] : memref<36xf32, #tpu.memory_space<smem>>
    %92 = vector.broadcast %91 : f32 to vector<2x16xf32>
    %93 = arith.mulf %90, %92 : vector<2x16xf32>
    %94 = arith.addf %74, %93 : vector<2x16xf32>
    %c0_17 = arith.constant 0 : index
    %c2_18 = arith.constant 2 : index
    %c0_19 = arith.constant 0 : index
    %95 = vector.load %arg5[%c0_17, %c2_18, %c0_19] : memref<2x4x24xf32, #tpu.memory_space<vmem>>, vector<2x1x24xf32>
    %96 = vector.shape_cast %95 : vector<2x1x24xf32> to vector<2x24xf32>
    %97 = vector.extract_strided_slice %96 {offsets = [0, 0], sizes = [2, 16], strides = [1, 1]} : vector<2x24xf32> to vector<2x16xf32>
    %c18 = arith.constant 18 : index
    %98 = memref.load %arg2[%c18] : memref<36xf32, #tpu.memory_space<smem>>
    %99 = vector.broadcast %98 : f32 to vector<2x16xf32>
    %100 = arith.mulf %97, %99 : vector<2x16xf32>
    %101 = arith.addf %94, %100 : vector<2x16xf32>
    %102 = vector.extract_strided_slice %96 {offsets = [0, 1], sizes = [2, 16], strides = [1, 1]} : vector<2x24xf32> to vector<2x16xf32>
    %c19 = arith.constant 19 : index
    %103 = memref.load %arg2[%c19] : memref<36xf32, #tpu.memory_space<smem>>
    %104 = vector.broadcast %103 : f32 to vector<2x16xf32>
    %105 = arith.mulf %102, %104 : vector<2x16xf32>
    %106 = arith.addf %79, %105 : vector<2x16xf32>
    %107 = vector.extract_strided_slice %96 {offsets = [0, 2], sizes = [2, 16], strides = [1, 1]} : vector<2x24xf32> to vector<2x16xf32>
    %c20_20 = arith.constant 20 : index
    %108 = memref.load %arg2[%c20_20] : memref<36xf32, #tpu.memory_space<smem>>
    %109 = vector.broadcast %108 : f32 to vector<2x16xf32>
    %110 = arith.mulf %107, %109 : vector<2x16xf32>
    %111 = arith.addf %84, %110 : vector<2x16xf32>
    %112 = vector.extract_strided_slice %96 {offsets = [0, 3], sizes = [2, 16], strides = [1, 1]} : vector<2x24xf32> to vector<2x16xf32>
    %c21 = arith.constant 21 : index
    %113 = memref.load %arg2[%c21] : memref<36xf32, #tpu.memory_space<smem>>
    %114 = vector.broadcast %113 : f32 to vector<2x16xf32>
    %115 = arith.mulf %112, %114 : vector<2x16xf32>
    %116 = arith.addf %89, %115 : vector<2x16xf32>
    %117 = vector.extract_strided_slice %96 {offsets = [0, 4], sizes = [2, 16], strides = [1, 1]} : vector<2x24xf32> to vector<2x16xf32>
    %c22 = arith.constant 22 : index
    %118 = memref.load %arg2[%c22] : memref<36xf32, #tpu.memory_space<smem>>
    %119 = vector.broadcast %118 : f32 to vector<2x16xf32>
    %120 = arith.mulf %117, %119 : vector<2x16xf32>
    %121 = arith.addf %101, %120 : vector<2x16xf32>
    %122 = vector.extract_strided_slice %96 {offsets = [0, 5], sizes = [2, 16], strides = [1, 1]} : vector<2x24xf32> to vector<2x16xf32>
    %c23 = arith.constant 23 : index
    %123 = memref.load %arg2[%c23] : memref<36xf32, #tpu.memory_space<smem>>
    %124 = vector.broadcast %123 : f32 to vector<2x16xf32>
    %125 = arith.mulf %122, %124 : vector<2x16xf32>
    %126 = arith.addf %106, %125 : vector<2x16xf32>
    %127 = vector.extract_strided_slice %96 {offsets = [0, 6], sizes = [2, 16], strides = [1, 1]} : vector<2x24xf32> to vector<2x16xf32>
    %c24 = arith.constant 24 : index
    %128 = memref.load %arg2[%c24] : memref<36xf32, #tpu.memory_space<smem>>
    %129 = vector.broadcast %128 : f32 to vector<2x16xf32>
    %130 = arith.mulf %127, %129 : vector<2x16xf32>
    %131 = arith.addf %111, %130 : vector<2x16xf32>
    %132 = vector.extract_strided_slice %96 {offsets = [0, 7], sizes = [2, 16], strides = [1, 1]} : vector<2x24xf32> to vector<2x16xf32>
    %c25 = arith.constant 25 : index
    %133 = memref.load %arg2[%c25] : memref<36xf32, #tpu.memory_space<smem>>
    %134 = vector.broadcast %133 : f32 to vector<2x16xf32>
    %135 = arith.mulf %132, %134 : vector<2x16xf32>
    %136 = arith.addf %116, %135 : vector<2x16xf32>
    %137 = vector.extract_strided_slice %96 {offsets = [0, 8], sizes = [2, 16], strides = [1, 1]} : vector<2x24xf32> to vector<2x16xf32>
    %c26 = arith.constant 26 : index
    %138 = memref.load %arg2[%c26] : memref<36xf32, #tpu.memory_space<smem>>
    %139 = vector.broadcast %138 : f32 to vector<2x16xf32>
    %140 = arith.mulf %137, %139 : vector<2x16xf32>
    %141 = arith.addf %121, %140 : vector<2x16xf32>
    %c0_21 = arith.constant 0 : index
    %c3_22 = arith.constant 3 : index
    %c0_23 = arith.constant 0 : index
    %142 = vector.load %arg5[%c0_21, %c3_22, %c0_23] : memref<2x4x24xf32, #tpu.memory_space<vmem>>, vector<2x1x24xf32>
    %143 = vector.shape_cast %142 : vector<2x1x24xf32> to vector<2x24xf32>
    %144 = vector.extract_strided_slice %143 {offsets = [0, 0], sizes = [2, 16], strides = [1, 1]} : vector<2x24xf32> to vector<2x16xf32>
    %c27 = arith.constant 27 : index
    %145 = memref.load %arg2[%c27] : memref<36xf32, #tpu.memory_space<smem>>
    %146 = vector.broadcast %145 : f32 to vector<2x16xf32>
    %147 = arith.mulf %144, %146 : vector<2x16xf32>
    %148 = arith.addf %141, %147 : vector<2x16xf32>
    %149 = vector.extract_strided_slice %143 {offsets = [0, 1], sizes = [2, 16], strides = [1, 1]} : vector<2x24xf32> to vector<2x16xf32>
    %c28 = arith.constant 28 : index
    %150 = memref.load %arg2[%c28] : memref<36xf32, #tpu.memory_space<smem>>
    %151 = vector.broadcast %150 : f32 to vector<2x16xf32>
    %152 = arith.mulf %149, %151 : vector<2x16xf32>
    %153 = arith.addf %126, %152 : vector<2x16xf32>
    %154 = vector.extract_strided_slice %143 {offsets = [0, 2], sizes = [2, 16], strides = [1, 1]} : vector<2x24xf32> to vector<2x16xf32>
    %c29 = arith.constant 29 : index
    %155 = memref.load %arg2[%c29] : memref<36xf32, #tpu.memory_space<smem>>
    %156 = vector.broadcast %155 : f32 to vector<2x16xf32>
    %157 = arith.mulf %154, %156 : vector<2x16xf32>
    %158 = arith.addf %131, %157 : vector<2x16xf32>
    %159 = vector.extract_strided_slice %143 {offsets = [0, 3], sizes = [2, 16], strides = [1, 1]} : vector<2x24xf32> to vector<2x16xf32>
    %c30 = arith.constant 30 : index
    %160 = memref.load %arg2[%c30] : memref<36xf32, #tpu.memory_space<smem>>
    %161 = vector.broadcast %160 : f32 to vector<2x16xf32>
    %162 = arith.mulf %159, %161 : vector<2x16xf32>
    %163 = arith.addf %136, %162 : vector<2x16xf32>
    %164 = vector.extract_strided_slice %143 {offsets = [0, 4], sizes = [2, 16], strides = [1, 1]} : vector<2x24xf32> to vector<2x16xf32>
    %c31 = arith.constant 31 : index
    %165 = memref.load %arg2[%c31] : memref<36xf32, #tpu.memory_space<smem>>
    %166 = vector.broadcast %165 : f32 to vector<2x16xf32>
    %167 = arith.mulf %164, %166 : vector<2x16xf32>
    %168 = arith.addf %148, %167 : vector<2x16xf32>
    %169 = vector.extract_strided_slice %143 {offsets = [0, 5], sizes = [2, 16], strides = [1, 1]} : vector<2x24xf32> to vector<2x16xf32>
    %c32 = arith.constant 32 : index
    %170 = memref.load %arg2[%c32] : memref<36xf32, #tpu.memory_space<smem>>
    %171 = vector.broadcast %170 : f32 to vector<2x16xf32>
    %172 = arith.mulf %169, %171 : vector<2x16xf32>
    %173 = arith.addf %153, %172 : vector<2x16xf32>
    %174 = vector.extract_strided_slice %143 {offsets = [0, 6], sizes = [2, 16], strides = [1, 1]} : vector<2x24xf32> to vector<2x16xf32>
    %c33 = arith.constant 33 : index
    %175 = memref.load %arg2[%c33] : memref<36xf32, #tpu.memory_space<smem>>
    %176 = vector.broadcast %175 : f32 to vector<2x16xf32>
    %177 = arith.mulf %174, %176 : vector<2x16xf32>
    %178 = arith.addf %158, %177 : vector<2x16xf32>
    %179 = vector.extract_strided_slice %143 {offsets = [0, 7], sizes = [2, 16], strides = [1, 1]} : vector<2x24xf32> to vector<2x16xf32>
    %c34 = arith.constant 34 : index
    %180 = memref.load %arg2[%c34] : memref<36xf32, #tpu.memory_space<smem>>
    %181 = vector.broadcast %180 : f32 to vector<2x16xf32>
    %182 = arith.mulf %179, %181 : vector<2x16xf32>
    %183 = arith.addf %163, %182 : vector<2x16xf32>
    %184 = vector.extract_strided_slice %143 {offsets = [0, 8], sizes = [2, 16], strides = [1, 1]} : vector<2x24xf32> to vector<2x16xf32>
    %c35 = arith.constant 35 : index
    %185 = memref.load %arg2[%c35] : memref<36xf32, #tpu.memory_space<smem>>
    %186 = vector.broadcast %185 : f32 to vector<2x16xf32>
    %187 = arith.mulf %184, %186 : vector<2x16xf32>
    %188 = arith.addf %168, %187 : vector<2x16xf32>
    %189 = arith.addf %188, %173 : vector<2x16xf32>
    %190 = arith.addf %178, %183 : vector<2x16xf32>
    %191 = arith.addf %189, %190 : vector<2x16xf32>
    %c0_24 = arith.constant 0 : index
    %192 = memref.load %arg3[%c0_24] : memref<1xf32, #tpu.memory_space<smem>>
    %193 = vector.broadcast %192 : f32 to vector<2x16xf32>
    %194 = arith.addf %191, %193 : vector<2x16xf32>
    %c0_25 = arith.constant 0 : index
    %c0_26 = arith.constant 0 : index
    %195 = vector.load %arg4[%c0_25, %c0_26] : memref<2x16xf32, #tpu.memory_space<vmem>>, vector<2x16xf32>
    tpu.vector_store %arg4[%c0_25, %c0_26], %194 {strides = array<i32>} : memref<2x16xf32, #tpu.memory_space<vmem>>, vector<2x16xf32>,
    return
  }
  func.func @transform_0(%arg0: i32) -> (i32, i32, i32) {
    %c0_i32 = arith.constant 0 : i32
    %c0_i32_0 = arith.constant 0 : i32
    %c0_i32_1 = arith.constant 0 : i32
    return %arg0, %c0_i32, %c0_i32_0 : i32, i32, i32
  }
  func.func @transform_1(%arg0: i32) -> i32 {
    %c0_i32 = arith.constant 0 : i32
    %c0_i32_0 = arith.constant 0 : i32
    return %c0_i32 : i32
  }
  func.func @transform_2(%arg0: i32) -> i32 {
    %c0_i32 = arith.constant 0 : i32
    %c0_i32_0 = arith.constant 0 : i32
    return %c0_i32 : i32
  }
  func.func @transform_3(%arg0: i32) -> (i32, i32) {
    %c0_i32 = arith.constant 0 : i32
    %c0_i32_0 = arith.constant 0 : i32
    return %arg0, %c0_i32 : i32, i32
  }
}

</mosaic_0001>

<bundles_post_ra>
// kernel: tpu_custom_call.1
= control target key start
LH: loop header
LB: loop body
LE: loop exit
PB: predicated region body
PF: predicated region fallthrough
CT: control target
= control target key end

     0   :  { %9 = vsyncpa [#allocation5], 0  ;;  %s852_s0 = inlined_call_operand.hbm [shape: f32[2,4,16], index: 0, kind: input, shape index: {}]   ;;  %s853_s1 = inlined_call_operand.vmem [shape: f32[36], index: 1, kind: input, shape index: {}]   ;;  %s854_s2 = inlined_call_operand.<no memory space> [shape: f32[1], index: 2, kind: input, shape index: {}]   ;;  %s855_s3 = inlined_call_operand.hbm [shape: f32[2,16], index: 3, kind: output, shape index: {}]  }
   0x1   :  { %10 = vsyncpa [#allocation7], 0 }
   0x2   :  { %11 = vsyncpa [#allocation6], 0  ;;  %s603_s12 = smov [#allocation4]   ;;  %s30_s16 = sshll.u32 %s853_s1, 4  ;;  %s31_s16 = int_to_ptr.vmem [resolvable:$true] %s30_s16 }
   0x3   :  { %s17_s13 = sshll.u32 %s603_s12, 4  ;;  %s541_s19 = scalar_lea.hbm %s852_s0, 128  ;;  %s18_s13 = int_to_ptr.vmem [resolvable:$true] %s17_s13 }
   0x4   :  { %p542_p0 = scmp.ne.s32.totalorder %s852_s0, %s541_s19  ;;  %p545_p1 = scmp.lt.u32.totalorder %s541_s19, %s852_s0 }
   0x6   :  { %p547_p2 = pnand %p545_p1, %p542_p0 }
   0x8   :  { %550 = shalt.err (!%p547_p2)
}
   0x9   :  { %s551_s24 = scalar_lea.vmem %s18_s13, 128  ;;  %p556_p4 = scmp.lt.s32.totalorder %s18_s13, %s18_s13 }
   0xa   :  { %p552_p3 = scmp.ne.s32.totalorder %s18_s13, %s551_s24  ;;  %p557_p5 = scmp.lt.s32.totalorder %s551_s24, %s551_s24 }
   0xc   :  { %p558_p6 = por %p557_p5, %p556_p4 }
   0xe   :  { %p559_p7 = pnand %p558_p6, %p552_p3 }
  0x10   :  { %562 = shalt.err (!%p559_p7)
}
  0x11   :  { %s604_s1 = smov 64   ;;  %s605_s25 = smov 4  }
  0x12   :  { %23 = dma.hbm_to_vmem [thread:$0]  %s852_s0, 128, %s18_s13, [#allocation5], %s604_s1, %s604_s1, %s605_s25  }
  0x13   :  { %s563_s28 = scalar_lea.vmem %s31_s16, 16  ;;  %p568_p9 = scmp.lt.s32.totalorder %s31_s16, %s31_s16 }
  0x14   :  { %p564_p8 = scmp.ne.s32.totalorder %s31_s16, %s563_s28  ;;  %p569_p10 = scmp.lt.s32.totalorder %s563_s28, %s563_s28 }
  0x16   :  { %p570_p11 = por %p569_p10, %p568_p9 }
  0x18   :  { %p571_p12 = pnand %p570_p11, %p564_p8 }
  0x1a   :  { %574 = shalt.err (!%p571_p12)
}
  0x1b   :  { %s606_s29 = smov [#allocation8]  }
  0x1c   :  { %33 = dma.vmem_to_smem %s31_s16, 16, %s606_s29, [#allocation7]  }
  0x1d   :  { %597 = dma.done.wait [#allocation5], 128  }
  0x1e   :  { %598 = vsyncadd [#allocation5], 4294967168 }
  0x1f   :  { %599 = dma.done.wait [#allocation7], 16  }
  0x20   :  { %600 = vsyncadd [#allocation7], 4294967280 }
  0x21   :  { %42 = sfence }
  0x22   :  { %v50_v0 = vld [vmem:[#allocation4 + $0x4] sm:$0xf]  ;;  %vm43_vm0 = vcmask 27648   ;;  %vm46_vm1 = vcmask 191648   ;;  %v49_v1 = vld [vmem:[#allocation4] sm:$0xf] }
  0x23   :  { %55 = vrot.lane.b32.xlu0 %v50_v0, %s605_s25  ;;  %v607_v2 = vmov 0.0   ;;  %vm59_vm2 = vcmask 158752   ;;  %s511_s0 = sld [smem:[#allocation8 + $0x10]]  ;;  %s502_s30 = sld [smem:[#allocation8 + $0x7]]  ;;  %vm475_vm3 = vcmask 1041409   ;;  %vm478_vm4 = vcmask 123904  }
  0x24   :  { %45 = vst.msk [vmem:[#allocation2 + $0x4] sm:$0xf] %vm43_vm0, %v607_v2  ;;  %44 = vst.msk [vmem:[#allocation2] sm:$0xf] %vm43_vm0, %v607_v2  ;;  %s648_s4 = sld [smem:[#allocation8 + $0x19]]  ;;  %s650_s5 = sld [smem:[#allocation8 + $0x22]] }
  0x25   :  { %48 = vst.msk [vmem:[#allocation2 + $0x4] sm:$0xf] %vm46_vm1, %v607_v2  ;;  %47 = vst.msk [vmem:[#allocation2] sm:$0xf] %vm46_vm1, %v607_v2  ;;  %s500_s6 = sld [smem:[#allocation8 + $0x5]]  ;;  %s608_s7 = smov 124  }
  0x26   :  { %s501_s8 = sld [smem:[#allocation8 + $0x6]]  ;;  %s510_s10 = sld [smem:[#allocation8 + $0xf]] }
  0x27   :  { %53 = vrot.lane.b32.xlu0 %v49_v1, %s605_s25  ;;  %s509_s9 = sld [smem:[#allocation8 + $0xe]]  ;;  %s518_s11 = sld [smem:[#allocation8 + $0x17]] }
  0x28   :  { %s519_s12 = sld [smem:[#allocation8 + $0x18]]  ;;  %s528_s14 = sld [smem:[#allocation8 + $0x21]] }
  0x29   :  { %v219_v5 = vstv %s511_s0  ;;  %v123_v6 = vstv %s502_s30  ;;  %s527_s13 = sld [smem:[#allocation8 + $0x20]]  ;;  %s498_s15 = sld [smem:[#allocation8 + $0x3]] }
  0x2a   :  { %v315_v12 = vstv %s648_s4  ;;  %v411_v17 = vstv %s650_s5  ;;  %s507_s16 = sld [smem:[#allocation8 + $0xc]]  ;;  %s718_s17 = sld [smem:[#allocation8 + $0x15]] }
  0x2b   :  { %v95_v21 = vstv %s500_s6  ;;  %s720_s18 = sld [smem:[#allocation8 + $0x1e]]  ;;  %s723_s19 = sld [smem:[#allocation8 + $0x1]] }
  0x2c   :  { %v109_v28 = vstv %s501_s8  ;;  %v205_v34 = vstv %s510_s10  ;;  %s727_s20 = sld [smem:[#allocation8 + $0xa]]  ;;  %s733_s21 = sld [smem:[#allocation8 + $0x4]] }
  0x2d   :  { %v191_v29 = vstv %s509_s9  ;;  %v287_v35 = vstv %s518_s11  ;;  %s736_s22 = sld [smem:[#allocation8 + $0x2]]  ;;  %s738_s23 = sld [smem:[#allocation8 + $0x8]] }
  0x2e   :  { %v301_v40 = vstv %s519_s12  ;;  %v397_v46 = vstv %s528_s14  ;;  %s743_s24 = sld [smem:[#allocation8 + $0xb]]  ;;  %s749_s25 = sld [smem:[#allocation8 + $0xd]] }
  0x2f   :  { %v383_v41 = vstv %s527_s13  ;;  %v77_v49 = vstv %s498_s15  ;;  %s745_s1 = sld [smem:[#allocation8 + $0x13]]  ;;  %s609_s26 = smov 127  }
  0x30   :  { %v171_v50 = vstv %s507_s16  ;;  %v267_v56 = vstv %s718_s17  ;;  %s757_s27 = sld [smem:[#allocation8 + $0x11]]  ;;  %s763_s28 = sld [smem:[#allocation8 + $0x14]] }
  0x31   :  { %v363_v1 = vstv %s720_s18  ;;  %s765_s29 = sld [smem:[#allocation8 + $0x1c]]  ;;  %s773_s0 = sld [smem:[#allocation8 + $0x16]] }
  0x32   :  { %s610_s30 = smov 120   ;;  %s787_s4 = sld [smem:[#allocation8 + $0x1a]] }
  0x33   :  { %s789_s5 = sld [smem:[#allocation8 + $0x1d]]  ;;  %s798_s6 = sld [smem:[#allocation8 + $0x1f]] }
  0x34   :  { %s530_s8 = sld [smem:[#allocation8 + $0x23]]  ;;  %s64_s9 = sld [smem:[#allocation8]] }
  0x35   :  { %s504_s10 = sld [smem:[#allocation8 + $0x9]]  ;;  %s513_s11 = sld [smem:[#allocation8 + $0x12]] }
  0x36   :  { %s522_s12 = sld [smem:[#allocation8 + $0x1b]]  ;;  %s612_s15 = smov [#allocation9]  }
  0x37   :  { %s486_s16 = sshll.u32 %s612_s15, 4  ;;  %s487_s16 = int_to_ptr.vmem [resolvable:$true] %s486_s16 }
  0x38   :  { %s575_s17 = scalar_lea.vmem %s487_s16, 32  ;;  %p580_p0 = scmp.lt.s32.totalorder %s487_s16, %s487_s16 }
  0x39   :  { %p576_p13 = scmp.ne.s32.totalorder %s487_s16, %s575_s17  ;;  %p581_p1 = scmp.lt.s32.totalorder %s575_s17, %s575_s17 }
  0x3b   :  { %p582_p2 = por %p581_p1, %p580_p0 }
  0x3d   :  { %p583_p3 = pnand %p582_p2, %p576_p13 }
  0x95   :  { %v56_v3 = vpop.permute.xlu0 %55 }
  0x96   :  { %61 = vst.msk [vmem:[#allocation2 + $0x4] sm:$0xf] %vm59_vm2, %v56_v3 }
  0x99   :  { %v54_v4 = vpop.permute.xlu0 %53 }
  0x9a   :  { %60 = vst.msk [vmem:[#allocation2] sm:$0xf] %vm59_vm2, %v54_v4 }
  0x9d   :  { %v652_v7 = vld [vmem:[#allocation2 + $0x5] sm:$0x1]  ;;  %v654_v8 = vld [vmem:[#allocation2 + $0x4] sm:$0x1]  ;;  %v658_v11 = vld [vmem:[#allocation2 + $0x6] sm:$0x1] }
  0x9e   :  { %v221_v9 = vmul.f32 %v219_v5, %v652_v7  ;;  %v125_v10 = vmul.f32 %v123_v6, %v654_v8  ;;  %v317_v15 = vmul.f32 %v315_v12, %v658_v11  ;;  %v667_v16 = vld [vmem:[#allocation2 + $0x7] sm:$0x1]  ;;  %v97_v23 = vmul.f32 %v95_v21, %v654_v8 }
  0x9f   :  { %v413_v19 = vmul.f32 %v411_v17, %v667_v16  ;;  %v111_v30 = vmul.f32 %v109_v28, %v654_v8  ;;  %v193_v31 = vmul.f32 %v191_v29, %v652_v7  ;;  %v207_v36 = vmul.f32 %v205_v34, %v652_v7 }
  0xa0   :  { %226 = vrot.lane.b32.xlu0 %v221_v9, %s608_s7  ;;  %130 = vrot.lane.b32.xlu1 %v125_v10, %s608_s7  ;;  %v289_v37 = vmul.f32 %v287_v35, %v658_v11  ;;  %v303_v42 = vmul.f32 %v301_v40, %v658_v11  ;;  %v385_v43 = vmul.f32 %v383_v41, %v667_v16 }
  0xa1   :  { %v663_v13 = vld [vmem:[#allocation2] sm:$0x1]  ;;  %v670_v18 = vld [vmem:[#allocation2 + $0x1] sm:$0x1]  ;;  %v676_v22 = vld [vmem:[#allocation2 + $0x2] sm:$0x1]  ;;  %v399_v47 = vmul.f32 %v397_v46, %v667_v16  ;;  %v79_v51 = vmul.f32 %v77_v49, %v654_v8  ;;  %v173_v54 = vmul.f32 %v171_v50, %v652_v7  ;;  %v269_v61 = vmul.f32 %v267_v56, %v658_v11 }
  0xa2   :  { %v124_v14 = vmul.f32 %v123_v6, %v663_v13  ;;  %v220_v20 = vmul.f32 %v219_v5, %v670_v18  ;;  %v316_v24 = vmul.f32 %v315_v12, %v676_v22  ;;  %v682_v25 = vld [vmem:[#allocation2 + $0x3] sm:$0x1]  ;;  %v96_v27 = vmul.f32 %v95_v21, %v663_v13 }
  0xa3   :  { %v412_v26 = vmul.f32 %v411_v17, %v682_v25  ;;  %v110_v32 = vmul.f32 %v109_v28, %v663_v13  ;;  %v192_v33 = vmul.f32 %v191_v29, %v670_v18  ;;  %v206_v38 = vmul.f32 %v205_v34, %v670_v18 }
  0xa4   :  { %322 = vrot.lane.b32.xlu0 %v317_v15, %s608_s7  ;;  %128 = vrot.lane.b32.xlu1 %v124_v14, %s608_s7  ;;  %v288_v39 = vmul.f32 %v287_v35, %v676_v22  ;;  %v302_v44 = vmul.f32 %v301_v40, %v676_v22  ;;  %v384_v45 = vmul.f32 %v383_v41, %v682_v25  ;;  %v69_v6 = vstv %s723_s19 }
  0xa5   :  { %v398_v48 = vmul.f32 %v397_v46, %v682_v25  ;;  %v78_v58 = vmul.f32 %v77_v49, %v663_v13  ;;  %v172_v0 = vmul.f32 %v171_v50, %v670_v18  ;;  %v365_v10 = vmul.f32 %v363_v1, %v667_v16 }
  0xa6   :  { %v268_v14 = vmul.f32 %v267_v56, %v676_v22  ;;  %v159_v15 = vstv %s727_s20  ;;  %v177_v50 = vstv %s749_s25 }
  0xa7   :  { %v161_v29 = vmul.f32 %v159_v15, %v652_v7  ;;  %v160_v41 = vmul.f32 %v159_v15, %v670_v18  ;;  %v273_v15 = vstv %s773_s0 }
  0xa8   :  { %418 = vrot.lane.b32.xlu0 %v413_v19, %s608_s7  ;;  %224 = vrot.lane.b32.xlu1 %v220_v20, %s608_s7  ;;  %v71_v19 = vmul.f32 %v69_v6, %v654_v8 }
  0xac   :  { %102 = vrot.lane.b32.xlu0 %v97_v23, %s608_s7  ;;  %320 = vrot.lane.b32.xlu1 %v316_v24, %s608_s7  ;;  %v364_v24 = vmul.f32 %v363_v1, %v682_v25 }
  0xb0   :  { %416 = vrot.lane.b32.xlu1 %v412_v26, %s608_s7  ;;  %100 = vrot.lane.b32.xlu0 %v96_v27, %s608_s7 }
  0xb4   :  { %116 = vrot.lane.b32.xlu1 %v111_v30, %s608_s7  ;;  %198 = vrot.lane.b32.xlu0 %v193_v31, %s608_s7  ;;  %v81_v30 = vstv %s733_s21 }
  0xb5   :  { %v83_v40 = vmul.f32 %v81_v30, %v654_v8  ;;  %v82_v49 = vmul.f32 %v81_v30, %v663_v13 }
  0xb8   :  { %114 = vrot.lane.b32.xlu1 %v110_v32, %s608_s7  ;;  %196 = vrot.lane.b32.xlu0 %v192_v33, %s608_s7  ;;  %v70_v32 = vmul.f32 %v69_v6, %v663_v13 }
  0xbc   :  { %212 = vrot.lane.b32.xlu1 %v207_v36, %s608_s7  ;;  %294 = vrot.lane.b32.xlu0 %v289_v37, %s608_s7  ;;  %v73_v36 = vstv %s736_s22  ;;  %v137_v37 = vstv %s738_s23 }
  0xc0   :  { %210 = vrot.lane.b32.xlu1 %v206_v38, %s608_s7  ;;  %292 = vrot.lane.b32.xlu0 %v288_v39, %s608_s7 }
  0xc4   :  { %308 = vrot.lane.b32.xlu1 %v303_v42, %s608_s7  ;;  %390 = vrot.lane.b32.xlu0 %v385_v43, %s608_s7  ;;  %v165_v42 = vstv %s743_s24  ;;  %v255_v43 = vstv %s745_s1 }
  0xc5   :  { %v166_v1 = vmul.f32 %v165_v42, %v670_v18 }
  0xc8   :  { %306 = vrot.lane.b32.xlu1 %v302_v44, %s608_s7  ;;  %388 = vrot.lane.b32.xlu0 %v384_v45, %s608_s7  ;;  %v75_v44 = vmul.f32 %v73_v36, %v654_v8 }
  0xcc   :  { %404 = vrot.lane.b32.xlu1 %v399_v47, %s608_s7 }
  0xd0   :  { %402 = vrot.lane.b32.xlu1 %v398_v48, %s608_s7  ;;  %v139_v48 = vmul.f32 %v137_v37, %v654_v8 }
 0x112   :  { %v227_v52 = vpop.permute.xlu0 %226  ;;  %v131_v53 = vpop.permute.xlu1 %130 }
 0x113   :  { %v135_v55 = vadd.f32 %v131_v53, %v79_v51  ;;  %v167_v53 = vmul.f32 %v165_v42, %v652_v7 }
 0x115   :  { %v175_v57 = vadd.f32 %v173_v54, %v135_v55  ;;  %v257_v54 = vmul.f32 %v255_v43, %v658_v11  ;;  %v74_v55 = vmul.f32 %v73_v36, %v663_v13 }
 0x116   :  { %v323_v59 = vpop.permute.xlu0 %322  ;;  %v129_v60 = vpop.permute.xlu1 %128 }
 0x117   :  { %v231_v62 = vadd.f32 %v227_v52, %v175_v57  ;;  %v134_v63 = vadd.f32 %v129_v60, %v78_v58  ;;  %v179_v60 = vmul.f32 %v177_v50, %v652_v7 }
 0x119   :  { %v271_v2 = vadd.f32 %v269_v61, %v231_v62  ;;  %v174_v3 = vadd.f32 %v172_v0, %v134_v63  ;;  %v138_v61 = vmul.f32 %v137_v37, %v663_v13  ;;  %v233_v62 = vstv %s757_s27 }
 0x11a   :  { %v419_v4 = vpop.permute.xlu0 %418  ;;  %v225_v5 = vpop.permute.xlu1 %224 }
 0x11b   :  { %v327_v9 = vadd.f32 %v323_v59, %v271_v2  ;;  %v230_v12 = vadd.f32 %v225_v5, %v174_v3  ;;  %v256_v2 = vmul.f32 %v255_v43, %v676_v22  ;;  %v261_v3 = vstv %s763_s28 }
 0x11c   :  { %v369_v43 = vstv %s798_s6 }
 0x11d   :  { %v367_v17 = vadd.f32 %v365_v10, %v327_v9  ;;  %v270_v20 = vadd.f32 %v268_v14, %v230_v12  ;;  %v235_v12 = vmul.f32 %v233_v62, %v652_v7  ;;  %v178_v14 = vmul.f32 %v177_v50, %v670_v18 }
 0x11e   :  { %v103_v21 = vpop.permute.xlu0 %102  ;;  %v321_v23 = vpop.permute.xlu1 %320  ;;  %v425_v50 = vstv %s530_s8 }
 0x11f   :  { %v423_v26 = vadd.f32 %v419_v4, %v367_v17  ;;  %v107_v27 = vadd.f32 %v103_v21, %v71_v19  ;;  %v326_v28 = vadd.f32 %v321_v23, %v270_v20  ;;  %v351_v4 = vstv %s765_s29 }
 0x120   :  { %v263_v20 = vmul.f32 %v261_v3, %v658_v11  ;;  %v353_v21 = vmul.f32 %v351_v4, %v667_v16 }
 0x121   :  { %452 = vrot.lane.b32.xlu0 %v423_v26, %s609_s26  ;;  %v366_v31 = vadd.f32 %v364_v24, %v326_v28  ;;  %v163_v33 = vadd.f32 %v161_v29, %v107_v27  ;;  %v275_v28 = vmul.f32 %v273_v15, %v658_v11  ;;  %v234_v29 = vmul.f32 %v233_v62, %v670_v18 }
 0x122   :  { %v417_v34 = vpop.permute.xlu1 %416  ;;  %v101_v35 = vpop.permute.xlu0 %100 }
 0x123   :  { %v422_v38 = vadd.f32 %v417_v34, %v366_v31  ;;  %v106_v39 = vadd.f32 %v101_v35, %v70_v32  ;;  %v262_v32 = vmul.f32 %v261_v3, %v676_v22  ;;  %v329_v34 = vstv %s787_s4 }
 0x124   :  { %v357_v35 = vstv %s789_s5 }
 0x125   :  { %88 = vrot.lane.b32.xlu0 %v83_v40, %s608_s7  ;;  %450 = vrot.lane.b32.xlu1 %v422_v38, %s609_s26  ;;  %v162_v45 = vadd.f32 %v160_v41, %v106_v39  ;;  %v331_v40 = vmul.f32 %v329_v34, %v658_v11  ;;  %v274_v41 = vmul.f32 %v273_v15, %v676_v22 }
 0x126   :  { %v117_v46 = vpop.permute.xlu1 %116  ;;  %v199_v47 = vpop.permute.xlu0 %198  ;;  %v359_v42 = vmul.f32 %v357_v35, %v667_v16 }
 0x127   :  { %v121_v51 = vadd.f32 %v117_v46, %v75_v44  ;;  %v203_v52 = vadd.f32 %v199_v47, %v163_v33  ;;  %v352_v33 = vmul.f32 %v351_v4, %v682_v25  ;;  %v371_v47 = vmul.f32 %v369_v43, %v667_v16 }
 0x129   :  { %144 = vrot.lane.b32.xlu0 %v139_v48, %s610_s30  ;;  %86 = vrot.lane.b32.xlu1 %v82_v49, %s608_s7  ;;  %v169_v56 = vadd.f32 %v167_v53, %v121_v51  ;;  %v259_v57 = vadd.f32 %v257_v54, %v203_v52  ;;  %v330_v48 = vmul.f32 %v329_v34, %v676_v22 }
 0x12a   :  { %v115_v58 = vpop.permute.xlu1 %114  ;;  %v197_v59 = vpop.permute.xlu0 %196  ;;  %v358_v49 = vmul.f32 %v357_v35, %v682_v25  ;;  %v427_v53 = vmul.f32 %v425_v50, %v667_v16  ;;  %v370_v54 = vmul.f32 %v369_v43, %v682_v25 }
 0x12b   :  { %v120_v63 = vadd.f32 %v115_v58, %v74_v55  ;;  %v202_v0 = vadd.f32 %v197_v59, %v162_v45 }
 0x12d   :  { %184 = vrot.lane.b32.xlu0 %v179_v60, %s608_s7  ;;  %142 = vrot.lane.b32.xlu1 %v138_v61, %s610_s30  ;;  %v168_v5 = vadd.f32 %v166_v1, %v120_v63  ;;  %v258_v6 = vadd.f32 %v256_v2, %v202_v0  ;;  %v65_v0 = vstv %s64_s9 }
 0x12e   :  { %v213_v9 = vpop.permute.xlu1 %212  ;;  %v295_v10 = vpop.permute.xlu0 %294  ;;  %v67_v4 = vmul.f32 %v65_v0, %v654_v8  ;;  %v66_v15 = vmul.f32 %v65_v0, %v663_v13  ;;  %v249_v8 = vstv %s513_s11 }
 0x12f   :  { %v217_v17 = vadd.f32 %v213_v9, %v169_v56  ;;  %v299_v19 = vadd.f32 %v295_v10, %v259_v57  ;;  %v426_v56 = vmul.f32 %v425_v50, %v682_v25 }
 0x131   :  { %240 = vrot.lane.b32.xlu0 %v235_v12, %s610_s30  ;;  %182 = vrot.lane.b32.xlu1 %v178_v14, %s608_s7  ;;  %v265_v23 = vadd.f32 %v263_v20, %v217_v17  ;;  %v355_v24 = vadd.f32 %v353_v21, %v299_v19 }
 0x132   :  { %v211_v26 = vpop.permute.xlu1 %210  ;;  %v293_v27 = vpop.permute.xlu0 %292 }
 0x133   :  { %v216_v30 = vadd.f32 %v211_v26, %v168_v5  ;;  %v298_v31 = vadd.f32 %v293_v27, %v258_v6  ;;  %v153_v6 = vstv %s504_s10 }
 0x134   :  { %v155_v17 = vmul.f32 %v153_v6, %v652_v7  ;;  %v154_v26 = vmul.f32 %v153_v6, %v670_v18 }
 0x135   :  { %280 = vrot.lane.b32.xlu0 %v275_v28, %s608_s7  ;;  %238 = vrot.lane.b32.xlu1 %v234_v29, %s610_s30  ;;  %v264_v36 = vadd.f32 %v262_v32, %v216_v30  ;;  %v354_v37 = vadd.f32 %v352_v33, %v298_v31  ;;  %v251_v32 = vmul.f32 %v249_v8, %v658_v11 }
 0x136   :  { %v309_v38 = vpop.permute.xlu1 %308  ;;  %v391_v52 = vpop.permute.xlu0 %390 }
 0x137   :  { %v313_v39 = vadd.f32 %v309_v38, %v265_v23  ;;  %v395_v55 = vadd.f32 %v391_v52, %v355_v24 }
 0x139   :  { %336 = vrot.lane.b32.xlu0 %v331_v40, %s610_s30  ;;  %278 = vrot.lane.b32.xlu1 %v274_v41, %s608_s7  ;;  %v361_v44 = vadd.f32 %v359_v42, %v313_v39 }
 0x13a   :  { %v307_v45 = vpop.permute.xlu1 %306  ;;  %v389_v57 = vpop.permute.xlu0 %388 }
 0x13b   :  { %v312_v46 = vadd.f32 %v307_v45, %v264_v36  ;;  %v394_v58 = vadd.f32 %v389_v57, %v354_v37  ;;  %v250_v36 = vmul.f32 %v249_v8, %v676_v22  ;;  %v345_v37 = vstv %s522_s12 }
 0x13c   :  { %v347_v42 = vmul.f32 %v345_v37, %v667_v16  ;;  %v346_v11 = vmul.f32 %v345_v37, %v682_v25  ;;  %v469_v16 = vstv %s854_s2 }
 0x13d   :  { %376 = vrot.lane.b32.xlu0 %v371_v47, %s608_s7  ;;  %334 = vrot.lane.b32.xlu1 %v330_v48, %s610_s30  ;;  %v360_v51 = vadd.f32 %v358_v49, %v312_v46 }
 0x13e   :  { %v405_v59 = vpop.permute.xlu1 %404 }
 0x13f   :  { %v409_v60 = vadd.f32 %v405_v59, %v361_v44 }
 0x141   :  { %432 = vrot.lane.b32.xlu0 %v427_v53, %s610_s30  ;;  %374 = vrot.lane.b32.xlu1 %v370_v54, %s608_s7  ;;  %s611_s7 = smov 126  }
 0x142   :  { %v403_v61 = vpop.permute.xlu1 %402 }
 0x143   :  { %v408_v1 = vadd.f32 %v403_v61, %v360_v51 }
 0x145   :  { %442 = vrot.lane.b32.xlu0 %v395_v55, %s609_s26  ;;  %430 = vrot.lane.b32.xlu1 %v426_v56, %s610_s30 }
 0x149   :  { %440 = vrot.lane.b32.xlu1 %v394_v58, %s609_s26 }
 0x193   :  { %v453_v62 = vpop.permute.xlu0 %452 }
 0x194   :  { %v457_v63 = vadd.f32 %v453_v62, %v409_v60 }
 0x196   :  { %462 = vrot.lane.b32.xlu0 %v457_v63, %s611_s7 }
 0x197   :  { %v89_v2 = vpop.permute.xlu0 %88  ;;  %v451_v3 = vpop.permute.xlu1 %450 }
 0x198   :  { %v456_v5 = vadd.f32 %v451_v3, %v408_v1  ;;  %v93_v9 = vadd.f32 %v89_v2, %v67_v4 }
 0x19a   :  { %460 = vrot.lane.b32.xlu1 %v456_v5, %s611_s7 }
 0x19b   :  { %v145_v10 = vpop.permute.xlu0 %144  ;;  %v87_v12 = vpop.permute.xlu1 %86 }
 0x19c   :  { %v149_v14 = vadd.f32 %v145_v10, %v93_v9  ;;  %v92_v19 = vadd.f32 %v87_v12, %v66_v15 }
 0x19e   :  { %v157_v20 = vadd.f32 %v155_v17, %v149_v14 }
 0x19f   :  { %v185_v21 = vpop.permute.xlu0 %184  ;;  %v143_v23 = vpop.permute.xlu1 %142 }
 0x1a0   :  { %v148_v24 = vadd.f32 %v143_v23, %v92_v19  ;;  %v189_v27 = vadd.f32 %v185_v21, %v157_v20 }
 0x1a2   :  { %v156_v28 = vadd.f32 %v154_v26, %v148_v24 }
 0x1a3   :  { %v241_v29 = vpop.permute.xlu0 %240  ;;  %v183_v30 = vpop.permute.xlu1 %182 }
 0x1a4   :  { %v245_v31 = vadd.f32 %v241_v29, %v189_v27  ;;  %v188_v33 = vadd.f32 %v183_v30, %v156_v28 }
 0x1a6   :  { %v253_v13 = vadd.f32 %v251_v32, %v245_v31 }
 0x1a7   :  { %v281_v34 = vpop.permute.xlu0 %280  ;;  %v239_v7 = vpop.permute.xlu1 %238 }
 0x1a8   :  { %v244_v35 = vadd.f32 %v239_v7, %v188_v33  ;;  %v285_v38 = vadd.f32 %v281_v34, %v253_v13 }
 0x1aa   :  { %v252_v39 = vadd.f32 %v250_v36, %v244_v35 }
 0x1ab   :  { %v337_v18 = vpop.permute.xlu0 %336  ;;  %v279_v40 = vpop.permute.xlu1 %278 }
 0x1ac   :  { %v341_v41 = vadd.f32 %v337_v18, %v285_v38  ;;  %v284_v43 = vadd.f32 %v279_v40, %v252_v39 }
 0x1ae   :  { %v349_v44 = vadd.f32 %v347_v42, %v341_v41 }
 0x1af   :  { %v335_v45 = vpop.permute.xlu1 %334  ;;  %v377_v48 = vpop.permute.xlu0 %376 }
 0x1b0   :  { %v340_v46 = vadd.f32 %v335_v45, %v284_v43  ;;  %v381_v22 = vadd.f32 %v377_v48, %v349_v44 }
 0x1b2   :  { %v348_v47 = vadd.f32 %v346_v11, %v340_v46 }
 0x1b3   :  { %v375_v49 = vpop.permute.xlu1 %374  ;;  %v433_v50 = vpop.permute.xlu0 %432 }
 0x1b4   :  { %v437_v53 = vadd.f32 %v433_v50, %v381_v22  ;;  %v380_v54 = vadd.f32 %v375_v49, %v348_v47 }
 0x1b7   :  { %v431_v51 = vpop.permute.xlu1 %430  ;;  %v443_v52 = vpop.permute.xlu0 %442 }
 0x1b8   :  { %v447_v55 = vadd.f32 %v443_v52, %v437_v53  ;;  %v436_v58 = vadd.f32 %v431_v51, %v380_v54 }
 0x1bb   :  { %v441_v56 = vpop.permute.xlu1 %440 }
 0x1bc   :  { %v446_v60 = vadd.f32 %v441_v56, %v436_v58 }
 0x208   :  { %v463_v57 = vpop.permute.xlu0 %462 }
 0x209   :  { %v467_v59 = vadd.f32 %v463_v57, %v447_v55 }
 0x20b   :  { %v471_v25 = vadd.f32 %v469_v16, %v467_v59 }
 0x20c   :  { %v461_v61 = vpop.permute.xlu1 %460 }
 0x20d   :  { %v466_v62 = vadd.f32 %v461_v61, %v446_v60  ;;  %v474_v63 = vrot.slane %v471_v25, 7 }
 0x20f   :  { %v470_v0 = vadd.f32 %v469_v16, %v466_v62 }
 0x211   :  { %v476_v1 = vsel %vm475_vm3, %v474_v63, %v470_v0 }
 0x212   :  { %479 = vst.msk [vmem:[#allocation9] sm:$0x3] %vm478_vm4, %v476_v1 }
 0x213   :  { %586 = shalt.err (!%p583_p3)
}
 0x214   :  { %s587_s19 = scalar_lea.hbm %s855_s3, 32 }
 0x215   :  { %p588_p4 = scmp.ne.s32.totalorder %s855_s3, %s587_s19  ;;  %p591_p5 = scmp.lt.u32.totalorder %s587_s19, %s855_s3 }
 0x217   :  { %p593_p6 = pnand %p591_p5, %p588_p4 }
 0x219   :  { %596 = shalt.err (!%p593_p6)
}
 0x21a   :  { %489 = dma.vmem_to_hbm [thread:$0]  %s487_s16, 32, %s855_s3, [#allocation6]  }
 0x21b   :  { %601 = dma.done.wait [#allocation6], 32  }
 0x21c   :  { %602 = vsyncadd [#allocation6], 4294967264 }
 0x21d   :  { %493 = vsyncpa [#allocation5], 1 }
 0x21e   :  { %494 = vsyncpa [#allocation6], 1 }
 0x21f   :  { %495 = vsyncpa [#allocation7], 1 }

</bundles_post_ra>
